<compile_context>
chip_gen: v5e
topology: v5e:2x2
jax: 0.10.0
libtpu: 0.0.40
codegen_flags: <defaults>
</compile_context>

<pallas_src>
import jax
import jax.numpy as jnp
import numpy as np
from jax.experimental import pallas as pl
from jax.experimental.pallas import tpu as pltpu

LOG_STD_MAX = 2.0
LOG_STD_MIN = -20.0
_HALF_LOG_2PI = 0.5 * float(np.log(2.0 * np.pi))
_LOG_2 = float(np.log(2.0))


def _round_up(n, m):
    return ((n + m - 1) // m) * m


def _nan_to_num(x):
    # torch.nan_to_num defaults: nan -> 0, +inf -> max float, -inf -> min float.
    big = jnp.finfo(jnp.float32).max
    x = jnp.where(jnp.isnan(x), jnp.float32(0.0), x)
    return jnp.clip(x, -big, big)


def _softplus(x):
    # numerically-stable softplus
    return jnp.maximum(x, 0.0) + jnp.log1p(jnp.exp(-jnp.abs(x)))


def actor_kernel(s_ref, eps_ref,
                 w1_ref, b1_ref, w2_ref, b2_ref,
                 wmu_ref, bmu_ref, wls_ref, bls_ref,
                 pi_ref, logp_ref):
    x = s_ref[...]

    # net = Linear -> ReLU -> Linear -> ReLU  (mlp with output_activation == activation)
    h1 = jnp.maximum(
        jnp.dot(x, w1_ref[...], preferred_element_type=jnp.float32) + b1_ref[...], 0.0)
    h2 = jnp.maximum(
        jnp.dot(h1, w2_ref[...], preferred_element_type=jnp.float32) + b2_ref[...], 0.0)

    # mu head: nan_to_num only (matches torch.nan_to_num(mu)).
    mu = _nan_to_num(
        jnp.dot(h2, wmu_ref[...], preferred_element_type=jnp.float32) + bmu_ref[...])

    # log_std head: clamp FIRST, then nan_to_num — same order as the PyTorch
    # module.  jnp.clip propagates NaN, so NaN still ends up as 0.
    log_std = _nan_to_num(jnp.clip(
        jnp.dot(h2, wls_ref[...], preferred_element_type=jnp.float32) + bls_ref[...],
        LOG_STD_MIN, LOG_STD_MAX))
    std = jnp.exp(log_std)

    # rsample: pi_action = mu + std * eps   (deterministic path == eps = 0)
    eps = eps_ref[...]
    pi_action = mu + std * eps

    # Normal(mu, std).log_prob(pi_action) with z == (pi - mu)/std == eps
    # (saves a subtract + divide), minus the tanh-squash correction; reduce
    # over the (un-padded) action lanes.
    logp_terms = -0.5 * eps * eps - log_std - _HALF_LOG_2PI
    corr = 2.0 * (_LOG_2 - pi_action - _softplus(-2.0 * pi_action))
    logp = jnp.sum(logp_terms - corr, axis=-1, keepdims=True)

    pi_ref[...] = pi_action
    logp_ref[...] = logp


def _pick_tile_b(batch, cap=4096):
    """Sublane-aligned batch tile.  One grid step for batches < 2048 rows
    (optimal on single-TC v5e/v6e); otherwise >= 2 steps of >= 1024 rows each
    so v7x can shard the batch axis across both TensorCores."""
    b8 = _round_up(batch, 8)
    if b8 < 2048:
        return b8
    n_steps = max(2, pl.cdiv(b8, cap))
    return _round_up(pl.cdiv(b8, n_steps), 8)


def actor_forward(s, eps, params, *, tile_b=None):
    """Runs the actor forward pass. Returns (pi_action, logp_pi)."""
    B, obs_dim = s.shape
    act_dim = eps.shape[1]
    w1, b1, w2, b2, wmu, bmu, wls, bls = params

    if tile_b is None:
        tile_b = _pick_tile_b(B)
    B_pad = _round_up(B, tile_b)
    if B_pad > B:  # only pay a (batch-dim-only) pad pass if not tile-aligned
        s = jnp.pad(s, ((0, B_pad - B), (0, 0)))
        eps = jnp.pad(eps, ((0, B_pad - B), (0, 0)))

    grid = (B_pad // tile_b,)
    fixed = lambda i: (0, 0)     # weights/biases: resident (same block every step)
    batched = lambda i: (i, 0)   # batch-tiled arrays

    pi, logp = pl.pallas_call(
        actor_kernel,
        out_shape=(jax.ShapeDtypeStruct((B_pad, act_dim), jnp.float32),
                   jax.ShapeDtypeStruct((B_pad, 1), jnp.float32)),
        grid_spec=pltpu.PrefetchScalarGridSpec(
            num_scalar_prefetch=0,
            grid=grid,
            in_specs=[
                pl.BlockSpec((tile_b, obs_dim), batched),   # s   (natural width)
                pl.BlockSpec((tile_b, act_dim), batched),   # eps (natural width)
                pl.BlockSpec(w1.shape, fixed),              # w1
                pl.BlockSpec(b1.shape, fixed),              # b1
                pl.BlockSpec(w2.shape, fixed),              # w2
                pl.BlockSpec(b2.shape, fixed),              # b2
                pl.BlockSpec(wmu.shape, fixed),             # w_mu
                pl.BlockSpec(bmu.shape, fixed),             # b_mu
                pl.BlockSpec(wls.shape, fixed),             # w_log_std
                pl.BlockSpec(bls.shape, fixed),             # b_log_std
            ],
            out_specs=[pl.BlockSpec((tile_b, act_dim), batched),   # pi_action
                       pl.BlockSpec((tile_b, 1), batched)],        # logp_pi
        ),
        compiler_params=pltpu.CompilerParams(
            dimension_semantics=("parallel",)),
    )(s, eps, w1, b1, w2, b2, wmu, bmu, wls, bls)

    return pi[:B], logp[:B, 0]


def reference_forward(s, eps, params):
    """Pure-JAX reference mirroring the PyTorch module semantics."""
    w1, b1, w2, b2, wmu, bmu, wls, bls = params
    h1 = jnp.maximum(s @ w1 + b1, 0.0)
    h2 = jnp.maximum(h1 @ w2 + b2, 0.0)
    mu = jnp.nan_to_num(h2 @ wmu + bmu)
    log_std = jnp.nan_to_num(jnp.clip(h2 @ wls + bls, LOG_STD_MIN, LOG_STD_MAX))
    std = jnp.exp(log_std)
    a = mu + std * eps
    logp = jnp.sum(-0.5 * ((a - mu) / std) ** 2 - log_std
                   - 0.5 * jnp.log(2.0 * jnp.pi), axis=-1)
    logp -= jnp.sum(2.0 * (jnp.log(2.0) - a - jax.nn.softplus(-2.0 * a)), axis=1)
    return a, logp


def init_params(key, obs_dim, hidden_sizes, act_dim):
    dims = [obs_dim] + list(hidden_sizes)
    keys = jax.random.split(key, 2 * (len(dims) - 1) + 4)
    params = []
    ki = 0
    # hidden MLP layers
    for i in range(len(dims) - 1):
        fan_in = dims[i]
        w = jax.random.normal(keys[ki], (dims[i], dims[i + 1]),
                              jnp.float32) / jnp.sqrt(jnp.float32(fan_in))
        b = jax.random.normal(keys[ki + 1], (1, dims[i + 1]), jnp.float32) * 0.01
        params += [w, b]
        ki += 2
    # mu head
    wmu = jax.random.normal(keys[ki], (dims[-1], act_dim),
                            jnp.float32) / jnp.sqrt(jnp.float32(dims[-1]))
    bmu = jax.random.normal(keys[ki + 1], (1, act_dim), jnp.float32) * 0.01
    # log_std head
    wls = jax.random.normal(keys[ki + 2], (dims[-1], act_dim),
                            jnp.float32) / jnp.sqrt(jnp.float32(dims[-1]))
    bls = jax.random.normal(keys[ki + 3], (1, act_dim), jnp.float32) * 0.01
    return params + [wmu, bmu, wls, bls]


if __name__ == "__main__":
    obs_dim = 16
    act_dim = 8
    hidden_sizes = (32, 32)
    batch = 16

    key = jax.random.PRNGKey(0)
    k_s, k_eps, k_p = jax.random.split(key, 3)

    s = jax.random.normal(k_s, (batch, obs_dim), jnp.float32)
    # reparameterization noise (deterministic=False path); pass zeros for deterministic
    eps = jax.random.normal(k_eps, (batch, act_dim), jnp.float32)
    params = init_params(k_p, obs_dim, hidden_sizes, act_dim)

    pi_action, logp_pi = actor_forward(s, eps, params)
    jax.block_until_ready((pi_action, logp_pi))

    pi_ref, logp_ref = reference_forward(s, eps, params)
    np.testing.assert_allclose(np.asarray(pi_action), np.asarray(pi_ref),
                               rtol=1e-5, atol=1e-5)
    np.testing.assert_allclose(np.asarray(logp_pi), np.asarray(logp_ref),
                               rtol=1e-5, atol=1e-5)

    print("KERNEL_OK")
</pallas_src>

<mosaic_0001>
module attributes {stable_mosaic.version = 11 : i64} {
  func.func @actor_kernel(%arg0: i32, %arg1: memref<16x16xf32, #tpu.memory_space<vmem>>, %arg2: memref<16x8xf32, #tpu.memory_space<vmem>>, %arg3: memref<16x32xf32, #tpu.memory_space<vmem>>, %arg4: memref<1x32xf32, #tpu.memory_space<vmem>>, %arg5: memref<32x32xf32, #tpu.memory_space<vmem>>, %arg6: memref<1x32xf32, #tpu.memory_space<vmem>>, %arg7: memref<32x8xf32, #tpu.memory_space<vmem>>, %arg8: memref<1x8xf32, #tpu.memory_space<vmem>>, %arg9: memref<32x8xf32, #tpu.memory_space<vmem>>, %arg10: memref<1x8xf32, #tpu.memory_space<vmem>>, %arg11: memref<16x8xf32, #tpu.memory_space<vmem>>, %arg12: memref<16x1xf32, #tpu.memory_space<vmem>>) attributes {dimension_semantics = [#tpu.dimension_semantics<parallel>], iteration_bounds = array<i64: 1>, scalar_prefetch = 0 : i64, scratch_operands = 0 : i64, tpu.core_type = #tpu.core_type<tc>, window_params = [{transform_indices = @transform_0, window_bounds = array<i64: 16, 16>}, {transform_indices = @transform_1, window_bounds = array<i64: 16, 8>}, {pipeline_mode = #tpu.pipeline_mode<synchronous>, transform_indices = @transform_2, window_bounds = array<i64: 16, 32>}, {pipeline_mode = #tpu.pipeline_mode<synchronous>, transform_indices = @transform_3, window_bounds = array<i64: 1, 32>}, {pipeline_mode = #tpu.pipeline_mode<synchronous>, transform_indices = @transform_4, window_bounds = array<i64: 32, 32>}, {pipeline_mode = #tpu.pipeline_mode<synchronous>, transform_indices = @transform_5, window_bounds = array<i64: 1, 32>}, {pipeline_mode = #tpu.pipeline_mode<synchronous>, transform_indices = @transform_6, window_bounds = array<i64: 32, 8>}, {pipeline_mode = #tpu.pipeline_mode<synchronous>, transform_indices = @transform_7, window_bounds = array<i64: 1, 8>}, {pipeline_mode = #tpu.pipeline_mode<synchronous>, transform_indices = @transform_8, window_bounds = array<i64: 32, 8>}, {pipeline_mode = #tpu.pipeline_mode<synchronous>, transform_indices = @transform_9, window_bounds = array<i64: 1, 8>}, {transform_indices = @transform_10, window_bounds = array<i64: 16, 8>}, {transform_indices = @transform_11, window_bounds = array<i64: 16, 1>}]} {
    %c0 = arith.constant 0 : index
    %c0_0 = arith.constant 0 : index
    %0 = vector.load %arg1[%c0, %c0_0] : memref<16x16xf32, #tpu.memory_space<vmem>>, vector<16x16xf32>
    %c0_1 = arith.constant 0 : index
    %c0_2 = arith.constant 0 : index
    %1 = vector.load %arg3[%c0_1, %c0_2] : memref<16x32xf32, #tpu.memory_space<vmem>>, vector<16x32xf32>
    %cst = arith.constant dense<0.000000e+00> : vector<16x32xf32>
    %2 = tpu.matmul %0, %1, %cst {dimension_numbers = #tpu.dot_dimension_numbers<[1], [0], [0], [1], [0, 0, 1, 1], [], []>} : vector<16x16xf32>, vector<16x32xf32>, vector<16x32xf32> -> vector<16x32xf32>
    %c0_3 = arith.constant 0 : index
    %c0_4 = arith.constant 0 : index
    %3 = vector.load %arg4[%c0_3, %c0_4] : memref<1x32xf32, #tpu.memory_space<vmem>>, vector<1x32xf32>
    %4 = vector.broadcast %3 : vector<1x32xf32> to vector<16x32xf32>
    %5 = arith.addf %2, %4 : vector<16x32xf32>
    %cst_5 = arith.constant 0.000000e+00 : f32
    %6 = vector.broadcast %cst_5 : f32 to vector<16x32xf32>
    %7 = arith.maximumf %5, %6 : vector<16x32xf32>
    %c0_6 = arith.constant 0 : index
    %c0_7 = arith.constant 0 : index
    %8 = vector.load %arg5[%c0_6, %c0_7] : memref<32x32xf32, #tpu.memory_space<vmem>>, vector<32x32xf32>
    %cst_8 = arith.constant dense<0.000000e+00> : vector<16x32xf32>
    %9 = tpu.matmul %7, %8, %cst_8 {dimension_numbers = #tpu.dot_dimension_numbers<[1], [0], [0], [1], [0, 0, 1, 1], [], []>} : vector<16x32xf32>, vector<32x32xf32>, vector<16x32xf32> -> vector<16x32xf32>
    %c0_9 = arith.constant 0 : index
    %c0_10 = arith.constant 0 : index
    %10 = vector.load %arg6[%c0_9, %c0_10] : memref<1x32xf32, #tpu.memory_space<vmem>>, vector<1x32xf32>
    %11 = vector.broadcast %10 : vector<1x32xf32> to vector<16x32xf32>
    %12 = arith.addf %9, %11 : vector<16x32xf32>
    %cst_11 = arith.constant 0.000000e+00 : f32
    %13 = vector.broadcast %cst_11 : f32 to vector<16x32xf32>
    %14 = arith.maximumf %12, %13 : vector<16x32xf32>
    %c0_12 = arith.constant 0 : index
    %c0_13 = arith.constant 0 : index
    %15 = vector.load %arg7[%c0_12, %c0_13] : memref<32x8xf32, #tpu.memory_space<vmem>>, vector<32x8xf32>
    %cst_14 = arith.constant dense<0.000000e+00> : vector<16x8xf32>
    %16 = tpu.matmul %14, %15, %cst_14 {dimension_numbers = #tpu.dot_dimension_numbers<[1], [0], [0], [1], [0, 0, 1, 1], [], []>} : vector<16x32xf32>, vector<32x8xf32>, vector<16x8xf32> -> vector<16x8xf32>
    %c0_15 = arith.constant 0 : index
    %c0_16 = arith.constant 0 : index
    %17 = vector.load %arg8[%c0_15, %c0_16] : memref<1x8xf32, #tpu.memory_space<vmem>>, vector<1x8xf32>
    %18 = vector.broadcast %17 : vector<1x8xf32> to vector<16x8xf32>
    %19 = arith.addf %16, %18 : vector<16x8xf32>
    %20 = arith.cmpf one, %19, %19 : vector<16x8xf32>
    %cst_17 = arith.constant 0.000000e+00 : f32
    %21 = vector.broadcast %cst_17 : f32 to vector<16x8xf32>
    %22 = arith.select %20, %21, %19 : vector<16x8xi1>, vector<16x8xf32>
    %cst_18 = arith.constant -3.40282347E+38 : f32
    %cst_19 = arith.constant 3.40282347E+38 : f32
    %23 = vector.broadcast %cst_18 : f32 to vector<16x8xf32>
    %24 = arith.maximumf %23, %22 : vector<16x8xf32>
    %25 = vector.broadcast %cst_19 : f32 to vector<16x8xf32>
    %26 = arith.minimumf %25, %24 : vector<16x8xf32>
    %c0_20 = arith.constant 0 : index
    %c0_21 = arith.constant 0 : index
    %27 = vector.load %arg9[%c0_20, %c0_21] : memref<32x8xf32, #tpu.memory_space<vmem>>, vector<32x8xf32>
    %cst_22 = arith.constant dense<0.000000e+00> : vector<16x8xf32>
    %28 = tpu.matmul %14, %27, %cst_22 {dimension_numbers = #tpu.dot_dimension_numbers<[1], [0], [0], [1], [0, 0, 1, 1], [], []>} : vector<16x32xf32>, vector<32x8xf32>, vector<16x8xf32> -> vector<16x8xf32>
    %c0_23 = arith.constant 0 : index
    %c0_24 = arith.constant 0 : index
    %29 = vector.load %arg10[%c0_23, %c0_24] : memref<1x8xf32, #tpu.memory_space<vmem>>, vector<1x8xf32>
    %30 = vector.broadcast %29 : vector<1x8xf32> to vector<16x8xf32>
    %31 = arith.addf %28, %30 : vector<16x8xf32>
    %cst_25 = arith.constant -2.000000e+01 : f32
    %cst_26 = arith.constant 2.000000e+00 : f32
    %32 = vector.broadcast %cst_25 : f32 to vector<16x8xf32>
    %33 = arith.maximumf %32, %31 : vector<16x8xf32>
    %34 = vector.broadcast %cst_26 : f32 to vector<16x8xf32>
    %35 = arith.minimumf %34, %33 : vector<16x8xf32>
    %36 = arith.cmpf one, %35, %35 : vector<16x8xf32>
    %cst_27 = arith.constant 0.000000e+00 : f32
    %37 = vector.broadcast %cst_27 : f32 to vector<16x8xf32>
    %38 = arith.select %36, %37, %35 : vector<16x8xi1>, vector<16x8xf32>
    %cst_28 = arith.constant -3.40282347E+38 : f32
    %cst_29 = arith.constant 3.40282347E+38 : f32
    %39 = vector.broadcast %cst_28 : f32 to vector<16x8xf32>
    %40 = arith.maximumf %39, %38 : vector<16x8xf32>
    %41 = vector.broadcast %cst_29 : f32 to vector<16x8xf32>
    %42 = arith.minimumf %41, %40 : vector<16x8xf32>
    %43 = math.exp %42 : vector<16x8xf32>
    %c0_30 = arith.constant 0 : index
    %c0_31 = arith.constant 0 : index
    %44 = vector.load %arg2[%c0_30, %c0_31] : memref<16x8xf32, #tpu.memory_space<vmem>>, vector<16x8xf32>
    %45 = arith.mulf %43, %44 : vector<16x8xf32>
    %46 = arith.addf %26, %45 : vector<16x8xf32>
    %cst_32 = arith.constant -5.000000e-01 : f32
    %47 = vector.broadcast %cst_32 : f32 to vector<16x8xf32>
    %48 = arith.mulf %47, %44 : vector<16x8xf32>
    %49 = arith.mulf %48, %44 : vector<16x8xf32>
    %50 = arith.subf %49, %42 : vector<16x8xf32>
    %cst_33 = arith.constant 0.918938517 : f32
    %51 = vector.broadcast %cst_33 : f32 to vector<16x8xf32>
    %52 = arith.subf %50, %51 : vector<16x8xf32>
    %cst_34 = arith.constant 0.693147182 : f32
    %53 = vector.broadcast %cst_34 : f32 to vector<16x8xf32>
    %54 = arith.subf %53, %46 : vector<16x8xf32>
    %cst_35 = arith.constant -2.000000e+00 : f32
    %55 = vector.broadcast %cst_35 : f32 to vector<16x8xf32>
    %56 = arith.mulf %55, %46 : vector<16x8xf32>
    %cst_36 = arith.constant 0.000000e+00 : f32
    %57 = vector.broadcast %cst_36 : f32 to vector<16x8xf32>
    %58 = arith.maximumf %56, %57 : vector<16x8xf32>
    %59 = math.absf %56 : vector<16x8xf32>
    %cst_37 = arith.constant 0.000000e+00 : f32
    %60 = vector.broadcast %cst_37 : f32 to vector<16x8xf32>
    %61 = arith.subf %60, %59 : vector<16x8xf32>
    %62 = math.exp %61 : vector<16x8xf32>
    %63 = math.log1p %62 : vector<16x8xf32>
    %64 = arith.addf %58, %63 : vector<16x8xf32>
    %65 = arith.subf %54, %64 : vector<16x8xf32>
    %cst_38 = arith.constant 2.000000e+00 : f32
    %66 = vector.broadcast %cst_38 : f32 to vector<16x8xf32>
    %67 = arith.mulf %66, %65 : vector<16x8xf32>
    %68 = arith.subf %52, %67 : vector<16x8xf32>
    %cst_39 = arith.constant dense<0.000000e+00> : vector<16xf32>
    %69 = vector.multi_reduction <add>, %68, %cst_39 [1] : vector<16x8xf32> to vector<16xf32>
    %70 = vector.shape_cast %69 : vector<16xf32> to vector<16x1xf32>
    %c0_40 = arith.constant 0 : index
    %c0_41 = arith.constant 0 : index
    %71 = vector.load %arg11[%c0_40, %c0_41] : memref<16x8xf32, #tpu.memory_space<vmem>>, vector<16x8xf32>
    tpu.vector_store %arg11[%c0_40, %c0_41], %46 {strides = array<i32>} : memref<16x8xf32, #tpu.memory_space<vmem>>, vector<16x8xf32>,
    %c0_42 = arith.constant 0 : index
    %c0_43 = arith.constant 0 : index
    %72 = vector.load %arg12[%c0_42, %c0_43] : memref<16x1xf32, #tpu.memory_space<vmem>>, vector<16x1xf32>
    tpu.vector_store %arg12[%c0_42, %c0_43], %70 {strides = array<i32>} : memref<16x1xf32, #tpu.memory_space<vmem>>, vector<16x1xf32>,
    return
  }
  func.func @transform_0(%arg0: i32) -> (i32, i32) {
    %c0_i32 = arith.constant 0 : i32
    %c0_i32_0 = arith.constant 0 : i32
    return %arg0, %c0_i32 : i32, i32
  }
  func.func @transform_1(%arg0: i32) -> (i32, i32) {
    %c0_i32 = arith.constant 0 : i32
    %c0_i32_0 = arith.constant 0 : i32
    return %arg0, %c0_i32 : i32, i32
  }
  func.func @transform_2(%arg0: i32) -> (i32, i32) {
    %c0_i32 = arith.constant 0 : i32
    %c0_i32_0 = arith.constant 0 : i32
    %c0_i32_1 = arith.constant 0 : i32
    return %c0_i32, %c0_i32_0 : i32, i32
  }
  func.func @transform_3(%arg0: i32) -> (i32, i32) {
    %c0_i32 = arith.constant 0 : i32
    %c0_i32_0 = arith.constant 0 : i32
    %c0_i32_1 = arith.constant 0 : i32
    return %c0_i32, %c0_i32_0 : i32, i32
  }
  func.func @transform_4(%arg0: i32) -> (i32, i32) {
    %c0_i32 = arith.constant 0 : i32
    %c0_i32_0 = arith.constant 0 : i32
    %c0_i32_1 = arith.constant 0 : i32
    return %c0_i32, %c0_i32_0 : i32, i32
  }
  func.func @transform_5(%arg0: i32) -> (i32, i32) {
    %c0_i32 = arith.constant 0 : i32
    %c0_i32_0 = arith.constant 0 : i32
    %c0_i32_1 = arith.constant 0 : i32
    return %c0_i32, %c0_i32_0 : i32, i32
  }
  func.func @transform_6(%arg0: i32) -> (i32, i32) {
    %c0_i32 = arith.constant 0 : i32
    %c0_i32_0 = arith.constant 0 : i32
    %c0_i32_1 = arith.constant 0 : i32
    return %c0_i32, %c0_i32_0 : i32, i32
  }
  func.func @transform_7(%arg0: i32) -> (i32, i32) {
    %c0_i32 = arith.constant 0 : i32
    %c0_i32_0 = arith.constant 0 : i32
    %c0_i32_1 = arith.constant 0 : i32
    return %c0_i32, %c0_i32_0 : i32, i32
  }
  func.func @transform_8(%arg0: i32) -> (i32, i32) {
    %c0_i32 = arith.constant 0 : i32
    %c0_i32_0 = arith.constant 0 : i32
    %c0_i32_1 = arith.constant 0 : i32
    return %c0_i32, %c0_i32_0 : i32, i32
  }
  func.func @transform_9(%arg0: i32) -> (i32, i32) {
    %c0_i32 = arith.constant 0 : i32
    %c0_i32_0 = arith.constant 0 : i32
    %c0_i32_1 = arith.constant 0 : i32
    return %c0_i32, %c0_i32_0 : i32, i32
  }
  func.func @transform_10(%arg0: i32) -> (i32, i32) {
    %c0_i32 = arith.constant 0 : i32
    %c0_i32_0 = arith.constant 0 : i32
    return %arg0, %c0_i32 : i32, i32
  }
  func.func @transform_11(%arg0: i32) -> (i32, i32) {
    %c0_i32 = arith.constant 0 : i32
    %c0_i32_0 = arith.constant 0 : i32
    return %arg0, %c0_i32 : i32, i32
  }
}

</mosaic_0001>

<bundles_post_ra>
// kernel: tpu_custom_call.1
= control target key start
LH: loop header
LB: loop body
LE: loop exit
PB: predicated region body
PF: predicated region fallthrough
CT: control target
= control target key end

     0   :  { %vm45_vm0 = vcmask 130048   ;;  %vm85_vm1 = vcmask 261120   ;;  %vm263_vm5 = vcmask 64512   ;;  %vm272_vm9 = vcmask 7168   ;;  %s471_s2 = inlined_call_operand.vmem [shape: f32[16,32], index: 2, kind: input, shape index: {}]   ;;  %s472_s0 = inlined_call_operand.vmem [shape: f32[16,16], index: 0, kind: input, shape index: {}]   ;;  %s473_s4 = inlined_call_operand.vmem [shape: f32[32,32], index: 4, kind: input, shape index: {}]   ;;  %s474_s3 = inlined_call_operand.vmem [shape: f32[1,32], index: 3, kind: input, shape index: {}]   ;;  %s475_s5 = inlined_call_operand.vmem [shape: f32[1,32], index: 5, kind: input, shape index: {}]   ;;  %s476_s6 = inlined_call_operand.vmem [shape: f32[32,8], index: 6, kind: input, shape index: {}]   ;;  %s477_s8 = inlined_call_operand.vmem [shape: f32[32,8], index: 8, kind: input, shape index: {}]   ;;  %s478_s7 = inlined_call_operand.vmem [shape: f32[1,8], index: 7, kind: input, shape index: {}]   ;;  %s479_s9 = inlined_call_operand.vmem [shape: f32[1,8], index: 9, kind: input, shape index: {}]   ;;  %s480_s1 = inlined_call_operand.vmem [shape: f32[16,8], index: 1, kind: input, shape index: {}]   ;;  %s481_s10 = inlined_call_operand.vmem [shape: f32[16,8], index: 10, kind: output, shape index: {0}]   ;;  %s482_s11 = inlined_call_operand.vmem [shape: f32[16,1], index: 11, kind: output, shape index: {1}]  }
   0x1   :  { %v40_v0 = vld [vmem:[%s471_s2 + $0x8] sm:$0xff]  ;;  %v39_v1 = vld [vmem:[%s471_s2] sm:$0xff]  ;;  %v80_v3 = vld [vmem:[%s473_s4 + $0x18] sm:$0xff] }
   0x2   :  { %66 = vmatpush.msra.mxu0 %v40_v0  ;;  %v37_v2 = vld [vmem:[%s472_s0] sm:$0xff]  ;;  %104 = vmatpush.msra.mxu1 %v80_v3  ;;  %v38_v4 = vld [vmem:[%s472_s0 + $0x8] sm:$0xff]  ;;  %v79_v5 = vld [vmem:[%s473_s4 + $0x10] sm:$0xff] }
   0x3   :  { %v78_v6 = vld [vmem:[%s473_s4 + $0x8] sm:$0xff]  ;;  %v77_v7 = vld [vmem:[%s473_s4] sm:$0xff]  ;;  %v120_v8 = vld [vmem:[%s476_s6 + $0x18] sm:$0xff] }
   0x4   :  { %67 = vmatpush.msra.mxu0 %v39_v1  ;;  %105 = vmatpush.msra.mxu1 %v79_v5  ;;  %v165_v9 = vld [vmem:[%s477_s8 + $0x18] sm:$0xff]  ;;  %v297_v10 = vld [vmem:[%s474_s3] ss:$0 sm:$0xff]  ;;  %v119_v17 = vld [vmem:[%s476_s6 + $0x10] sm:$0xff] }
   0x5   :  { %283 = vmatmul.msk.f32.vlgmr.msra.gmra.mxu0 %vm45_vm0, %v37_v2  ;;  %143 = vmatpush.msra.mxu2 %v120_v8  ;;  %v164_v18 = vld [vmem:[%s477_s8 + $0x10] sm:$0xff]  ;;  %v118_v19 = vld [vmem:[%s476_s6 + $0x8] sm:$0xff]  ;;  %v117_v21 = vld [vmem:[%s476_s6] sm:$0xff] }
   0x6   :  { %106 = vmatpush.msra.mxu1 %v78_v6  ;;  %182 = vmatpush.msra.mxu3 %v165_v9  ;;  %v163_v20 = vld [vmem:[%s477_s8 + $0x8] sm:$0xff]  ;;  %v162_v22 = vld [vmem:[%s477_s8] sm:$0xff] }
   0x7   :  { %144 = vmatpush.msra.mxu2 %v119_v17  ;;  %v298_v23 = vld [vmem:[%s475_s5] ss:$0 sm:$0xff]  ;;  %v210_v60 = vld [vmem:[%s480_s1 + $0x8] sm:$0xff] }
   0x8   :  { %107 = vmatpush.msra.mxu1 %v77_v7  ;;  %183 = vmatpush.msra.mxu3 %v164_v18  ;;  %v300_v30 = vld [vmem:[%s479_s9] ss:$0 sm:$0xff] }
   0x9   :  { %145 = vmatpush.msra.mxu2 %v118_v19  ;;  %v299_v36 = vld [vmem:[%s478_s7] ss:$0 sm:$0xff] }
   0xa   :  { %184 = vmatpush.msra.mxu3 %v163_v20  ;;  %v209_v52 = vld [vmem:[%s480_s1] sm:$0xff] }
   0xb   :  { %146 = vmatpush.msra.mxu2 %v117_v21  ;;  %v215_v9 = vmul.f32 -0.5, %v209_v52 }
   0xc   :  { %185 = vmatpush.msra.mxu3 %v162_v22 }
   0xd   :  { %284 = vmatmul.msk.f32.gmra.mxu0 %vm45_vm0, %v38_v4 }
  0x82   :  { %v69_v11 = vpop.f32.mrf.mxu0 }
  0x83   :  { %v70_v12 = vadd.f32 %v297_v10, %v69_v11 }
  0x85   :  { %v75_v13 = vmax.f32 %v70_v12, 0.0 }
  0x87   :  { %285 = vmatmul.msk.f32.vlgmr.msra.gmra.mxu1 %vm85_vm1, %v75_v13 }
  0x8a   :  { %v72_v14 = vpop.f32.mrf.mxu0 }
  0x8b   :  { %v73_v15 = vadd.f32 %v297_v10, %v72_v14  ;;  %v217_v14 = vmul.f32 %v215_v9, %v209_v52 }
  0x8d   :  { %v76_v16 = vmax.f32 %v73_v15, 0.0 }
  0x8f   :  { %286 = vmatmul.msk.f32.gmra.mxu1 %vm85_vm1, %v76_v16 }
 0x104   :  { %v109_v24 = vpop.f32.mrf.mxu1 }
 0x105   :  { %v110_v25 = vadd.f32 %v298_v23, %v109_v24  ;;  %v216_v24 = vmul.f32 -0.5, %v210_v60 }
 0x107   :  { %v115_v26 = vmax.f32 %v110_v25, 0.0 }
 0x109   :  { %287 = vmatmul.msk.f32.vlgmr.msra.gmra.mxu2 %vm85_vm1, %v115_v26  ;;  %291 = vmatmul.msk.f32.vlgmr.msra.gmra.mxu3 %vm85_vm1, %v115_v26 }
 0x10c   :  { %v112_v27 = vpop.f32.mrf.mxu1 }
 0x10d   :  { %v113_v28 = vadd.f32 %v298_v23, %v112_v27 }
 0x10f   :  { %v116_v29 = vmax.f32 %v113_v28, 0.0 }
 0x111   :  { %288 = vmatmul.msk.f32.gmra.mxu2 %vm85_vm1, %v116_v29  ;;  %292 = vmatmul.msk.f32.gmra.mxu3 %vm85_vm1, %v116_v29 }
 0x18c   :  { %v187_v31 = vpop.f32.mrf.mxu3  ;;  %v148_v34 = vpop.f32.mrf.mxu2 }
 0x18d   :  { %v188_v32 = vadd.f32 %v300_v30, %v187_v31  ;;  %v149_v41 = vadd.f32 %v299_v36, %v148_v34  ;;  %v218_v31 = vmul.f32 %v216_v24, %v210_v60 }
 0x18f   :  { %v193_v33 = vmax.f32 %v188_v32, -20.0  ;;  %vm154_vm3 = vcmp.ne.f32.partialorder %v149_v41, %v149_v41 }
 0x190   :  { %v156_v47 = vsel %vm154_vm3, 0.0, %v149_v41 }
 0x191   :  { %v195_v35 = vmin.f32 %v193_v33, 2.0  ;;  %v289_v53 = vclamps-f32 %v156_v47, 3.4028235e+38 }
 0x193   :  { %vm197_vm2 = vcmp.ne.f32.partialorder %v195_v35, %v195_v35 }
 0x194   :  { %v439_v37 = vsel %vm197_vm2, 0.0, %v195_v35  ;;  %v190_v38 = vpop.f32.mrf.mxu3  ;;  %v151_v45 = vpop.f32.mrf.mxu2 }
 0x195   :  { %v293_v39 = vclamps-f32 %v439_v37, 3.4028235e+38  ;;  %v191_v40 = vadd.f32 %v300_v30, %v190_v38  ;;  %v152_v49 = vadd.f32 %v299_v36, %v151_v45 }
 0x197   :  { %v205_v42 = vmul.f32 1.442695, %v293_v39  ;;  %v194_v43 = vmax.f32 %v191_v40, -20.0  ;;  %vm155_vm6 = vcmp.ne.f32.partialorder %v152_v49, %v152_v49  ;;  %v219_v21 = vsub.f32 %v217_v14, %v293_v39 }
 0x198   :  { %v157_v57 = vsel %vm155_vm6, 0.0, %v152_v49 }
 0x199   :  { %301 = vpow2.f32 %v205_v42  ;;  %v196_v44 = vmin.f32 %v194_v43, 2.0  ;;  %v290_v61 = vclamps-f32 %v157_v57, 3.4028235e+38  ;;  %v295_v29 = vadd.f32 -0.9189385, %v219_v21 }
 0x19b   :  { %vm198_vm4 = vcmp.ne.f32.partialorder %v196_v44, %v196_v44 }
 0x19c   :  { %v442_v46 = vsel %vm198_vm4, 0.0, %v196_v44 }
 0x19d   :  { %v294_v48 = vclamps-f32 %v442_v46, 3.4028235e+38 }
 0x19f   :  { %v302_v50 = vpop.eup %301  ;;  %v207_v51 = vmul.f32 1.442695, %v294_v48  ;;  %v220_v38 = vsub.f32 %v218_v31, %v294_v48 }
 0x1a0   :  { %v211_v54 = vmul.f32 %v302_v50, %v209_v52 }
 0x1a1   :  { %303 = vpow2.f32 %v207_v51  ;;  %v296_v42 = vadd.f32 -0.9189385, %v220_v38 }
 0x1a2   :  { %v213_v55 = vadd.f32 %v289_v53, %v211_v54 }
 0x1a4   :  { %v225_v56 = vmul.f32 -2.0, %v213_v55  ;;  %270 = vst.msk [vmem:[%s481_s10] sm:$0xff] %vm263_vm5, %v213_v55  ;;  %v223_v22 = vsub.f32 0.6931472, %v213_v55 }
 0x1a6   :  { %v229_v58 = vand.u32 2147483647, %v225_v56  ;;  %v227_v19 = vmax.f32 %v225_v56, 0.0 }
 0x1a7   :  { %v304_v59 = vpop.eup %303 }
 0x1a8   :  { %v212_v62 = vmul.f32 %v304_v59, %v210_v60  ;;  %v231_v63 = vsub.f32 0.0, %v229_v58 }
 0x1aa   :  { %v214_v0 = vadd.f32 %v290_v61, %v212_v62  ;;  %v233_v1 = vmul.f32 1.442695, %v231_v63 }
 0x1ac   :  { %305 = vpow2.f32 %v233_v1  ;;  %271 = vst.msk [vmem:[%s481_s10 + $0x8] sm:$0xff] %vm263_vm5, %v214_v0  ;;  %v226_v2 = vmul.f32 -2.0, %v214_v0  ;;  %v224_v39 = vsub.f32 0.6931472, %v214_v0 }
 0x1ae   :  { %v230_v3 = vand.u32 2147483647, %v226_v2  ;;  %v228_v35 = vmax.f32 %v226_v2, 0.0 }
 0x1b0   :  { %v232_v4 = vsub.f32 0.0, %v230_v3 }
 0x1b2   :  { %v306_v5 = vpop.eup %305  ;;  %v235_v6 = vmul.f32 1.442695, %v232_v4 }
 0x1b3   :  { %v237_v7 = vadd.f32 1.0, %v306_v5  ;;  %v240_v8 = vmul.f32 -0.5, %v306_v5  ;;  %v243_v11 = vand.u32 2147483647, %v306_v5 }
 0x1b4   :  { %307 = vpow2.f32 %v235_v6 }
 0x1b5   :  { %309 = vlog2.f32 %v237_v7  ;;  %v241_v10 = vadd.f32 1.0, %v240_v8  ;;  %vm244_vm7 = vcmp.lt.f32.partialorder %v243_v11, 0.0004427343 }
 0x1b7   :  { %v242_v17 = vmul.f32 %v306_v5, %v241_v10 }
 0x1ba   :  { %v308_v12 = vpop.eup %307 }
 0x1bb   :  { %v310_v13 = vpop.eup %309  ;;  %v246_v15 = vadd.f32 1.0, %v308_v12  ;;  %v249_v18 = vmul.f32 -0.5, %v308_v12  ;;  %v252_v27 = vand.u32 2147483647, %v308_v12 }
 0x1bc   :  { %v239_v16 = vmul.f32 0.6931472, %v310_v13 }
 0x1bd   :  { %311 = vlog2.f32 %v246_v15  ;;  %v250_v25 = vadd.f32 1.0, %v249_v18  ;;  %vm253_vm8 = vcmp.lt.f32.partialorder %v252_v27, 0.0004427343 }
 0x1be   :  { %v245_v20 = vsel %vm244_vm7, %v242_v17, %v239_v16 }
 0x1bf   :  { %v255_v23 = vadd.f32 %v245_v20, %v227_v19  ;;  %v251_v33 = vmul.f32 %v308_v12, %v250_v25 }
 0x1c1   :  { %v257_v26 = vsub.f32 %v223_v22, %v255_v23 }
 0x1c3   :  { %v312_v28 = vpop.eup %311  ;;  %v259_v30 = vmul.f32 2.0, %v257_v26 }
 0x1c4   :  { %v248_v32 = vmul.f32 0.6931472, %v312_v28 }
 0x1c5   :  { %v261_v34 = vsub.f32 %v295_v29, %v259_v30 }
 0x1c6   :  { %v254_v36 = vsel %vm253_vm8, %v251_v33, %v248_v32 }
 0x1c7   :  { %v264_v37 = vsel %vm263_vm5, %v261_v34, 0.0  ;;  %v256_v40 = vadd.f32 %v254_v36, %v228_v35 }
 0x1c8   :  { %265 = vadd.xlane.f32.xlu0 %v264_v37 }
 0x1c9   :  { %v258_v41 = vsub.f32 %v224_v39, %v256_v40 }
 0x1cb   :  { %v260_v43 = vmul.f32 2.0, %v258_v41 }
 0x1cd   :  { %v262_v44 = vsub.f32 %v296_v42, %v260_v43 }
 0x1cf   :  { %v267_v45 = vsel %vm263_vm5, %v262_v44, 0.0 }
 0x1d0   :  { %268 = vadd.xlane.f32.xlu0 %v267_v45 }
 0x23b   :  { %v266_v47 = vpop.xlane.xlu0 %265 }
 0x23c   :  { %273 = vst.msk [vmem:[%s482_s11] sm:$0xff] %vm272_vm9, %v266_v47 }
 0x243   :  { %v269_v49 = vpop.xlane.xlu0 %268 }
 0x244   :  { %274 = vst.msk [vmem:[%s482_s11 + $0x8] sm:$0xff] %vm272_vm9, %v269_v49 }

</bundles_post_ra>
